<compile_context>
chip_gen: v5e
topology: v5e:2x2
jax: 0.10.0
libtpu: 0.0.40
codegen_flags: <defaults>
</compile_context>

<pallas_src>
import functools
import math

import jax
import jax.numpy as jnp
from jax.experimental import pallas as pl
from jax.experimental.pallas import tpu as pltpu

EPS = 1e-5
LATENT_DIM = 64


def _round_up(x, m):
    return (x + m - 1) // m * m


def _pick_block_rows(m):
    """Rows of flattened (batch, step) groups per grid step."""
    m8 = _round_up(max(m, 1), 8)
    tb = min(512, m8)                       # big tiles amortize per-step overhead
    if m8 // tb < 2 and m8 >= 16:           # aim for >= 2 blocks (megacore "parallel")
        tb = _round_up(m8 // 2, 8)
    return tb


def _attention_kernel(x_ref, w1_ref, w2_ref, ex_ref, c_ref, o_ref, *, d_real):
    """Fused attention reweighting on lane-dense (rows, D*F) tiles.

    x_ref : (TB, D*F)   float32
    w1_ref: (D*F, D*L)  bfloat16   block-diagonal first projection
    w2_ref: (D*L, CW)   float32    per-slice second-projection columns (zero padded)
    ex_ref: (CW, D*F)   float32    0/1 expansion (column d -> the F lanes of slice d)
    c_ref : (1, 1)      float32    folded bias  b1 . w2 + b2
    o_ref : (TB, D*F)   float32
    """
    x = x_ref[...]

    # All D per-slice projections in a single MXU pass: bf16 x bf16 -> f32 accumulate.
    h = jnp.dot(x.astype(jnp.bfloat16), w1_ref[...],
                preferred_element_type=jnp.float32)           # (TB, D*L)
    h = jnp.maximum(h, 0.0)                                   # ReLU before bias (as in ref)

    # Per-slice scores in a 128-wide column space; only the first d_real columns are real.
    e = jnp.dot(h, w2_ref[...], preferred_element_type=jnp.float32) + c_ref[...]
    p = jnp.exp(jnp.tanh(e))                                  # (TB, CW)

    col = jax.lax.broadcasted_iota(jnp.int32, p.shape, 1)
    p = jnp.where(col < d_real, p, 0.0)                       # mask padded columns
    denom = jnp.sum(p, axis=-1, keepdims=True) + EPS          # (TB, 1)
    scale = p * pl.reciprocal(denom, approx=True) + 1.0       # a + 1 (residual folded in)

    # Broadcast each slice's scale across its F feature lanes with a 0/1 matmul
    # (padded columns hit zero rows of ex_ref and vanish), then rescale x in place.
    a_exp = jnp.dot(scale, ex_ref[...], preferred_element_type=jnp.float32)
    o_ref[...] = (x * a_exp).astype(o_ref.dtype)


def pack_params(w1, b1, w2, b2, dims_to_weight):
    """Pre-pack parameters once, outside the jitted forward."""
    F, L = w1.shape
    D = int(dims_to_weight)
    CW = _round_up(D, 128)                                    # column-space width (>= 128)

    w1f = jnp.asarray(w1, jnp.float32)
    w2f = jnp.asarray(w2, jnp.float32).reshape(L)
    eye = jnp.eye(D, dtype=jnp.float32)

    w1_packed = jnp.kron(eye, w1f).astype(jnp.bfloat16)       # (D*F, D*L) block diagonal
    w2_packed = jnp.kron(eye, w2f.reshape(L, 1))              # (D*L, D)
    w2_packed = jnp.pad(w2_packed, ((0, 0), (0, CW - D)))     # (D*L, CW)
    expand = jnp.kron(eye, jnp.ones((1, F), jnp.float32))     # (D, D*F)
    expand = jnp.pad(expand, ((0, CW - D), (0, 0)))           # (CW, D*F)

    if b1 is not None and b2 is not None:
        c = jnp.dot(jnp.asarray(b1, jnp.float32), w2f) \
            + jnp.asarray(b2, jnp.float32).reshape(())
    else:
        c = jnp.zeros((), jnp.float32)

    return {
        "w1": w1_packed,
        "w2": w2_packed,
        "expand": expand,
        "c": c.reshape(1, 1),
    }


@jax.jit
def attention_forward(packed, x):
    B, S, D, F = x.shape
    DF = D * F
    DL = packed["w1"].shape[1]
    CW = packed["w2"].shape[1]
    M = B * S                                                 # normalization groups

    xg = x.reshape(M, DF).astype(jnp.float32)                 # lane-dense layout

    TB = _pick_block_rows(M)
    Mp = _round_up(M, TB)
    if Mp != M:
        # Zero rows are harmless: they produce finite weights and zero outputs, then sliced off.
        xg = jnp.pad(xg, ((0, Mp - M), (0, 0)))

    kernel = functools.partial(_attention_kernel, d_real=D)

    out = pl.pallas_call(
        kernel,
        out_shape=jax.ShapeDtypeStruct((Mp, DF), jnp.float32),
        grid_spec=pltpu.PrefetchScalarGridSpec(
            num_scalar_prefetch=0,
            grid=(Mp // TB,),
            in_specs=[
                pl.BlockSpec((TB, DF), lambda i: (i, 0)),     # activations (lane-dense)
                pl.BlockSpec((DF, DL), lambda i: (0, 0)),     # W1 block-diag (bf16), resident
                pl.BlockSpec((DL, CW), lambda i: (0, 0)),     # packed w2 columns, resident
                pl.BlockSpec((CW, DF), lambda i: (0, 0)),     # expansion matrix, resident
                pl.BlockSpec((1, 1), lambda i: (0, 0)),       # folded bias scalar
            ],
            out_specs=pl.BlockSpec((TB, DF), lambda i: (i, 0)),
        ),
        compiler_params=pltpu.CompilerParams(
            dimension_semantics=("parallel",)),
    )(xg, packed["w1"], packed["w2"], packed["expand"], packed["c"])

    return out[:M].reshape(B, S, D, F).astype(x.dtype)


def attention_ref(x, w1, b1, w2, b2, eps=EPS):
    """Pure-JAX reference mirroring the PyTorch forward, for verification."""
    eij = jnp.maximum(jnp.matmul(x, w1), 0.0)
    eij = eij + b1
    eij = jnp.matmul(eij, w2) + b2
    eij = jnp.tanh(eij)
    a = jnp.exp(eij)
    a = a / (jnp.sum(a, axis=2, keepdims=True) + eps)
    return x * a + x


if __name__ == "__main__":
    # (batch_size, step_dim, dims_to_weight, features_dim); latent_dim = 64 per module.
    B, S, D, F = 2, 8, 4, 32
    L = LATENT_DIM

    key = jax.random.PRNGKey(0)
    k_x, k_w1, k_w2, k_b1, k_b2 = jax.random.split(key, 5)
    x = jax.random.normal(k_x, (B, S, D, F), jnp.float32)

    # Mirror the module's reset_parameters for the weights.  The module zero-inits the
    # biases; small non-zero biases are used here so the bias path is actually exercised.
    stdv1 = 1.0 / math.sqrt(L)
    w1 = jax.random.uniform(k_w1, (F, L), jnp.float32, -stdv1, stdv1)
    w2 = jax.random.uniform(k_w2, (L, 1), jnp.float32, -1.0, 1.0)
    b1 = 0.1 * jax.random.normal(k_b1, (L,), jnp.float32)
    b2 = 0.1 * jax.random.normal(k_b2, (1,), jnp.float32)

    packed = pack_params(w1, b1, w2, b2, dims_to_weight=D)
    out = jax.block_until_ready(attention_forward(packed, x))

    ref = attention_ref(x, w1, b1, w2, b2)
    assert out.shape == (B, S, D, F), out.shape
    assert bool(jnp.all(jnp.isfinite(out)))
    # bf16 MXU inputs introduce small deviations vs the fp32 reference; structural bugs
    # (wrong normalization axis, missing residual, ...) would blow past both bounds.
    max_err = float(jnp.max(jnp.abs(out - ref)))
    mean_err = float(jnp.mean(jnp.abs(out - ref)))
    assert max_err < 1e-1, max_err
    assert mean_err < 1e-2, mean_err
    print("KERNEL_OK")
</pallas_src>

<mosaic_0001>
module attributes {stable_mosaic.version = 11 : i64} {
  func.func @_attention_kernel(%arg0: i32, %arg1: memref<8x128xf32, #tpu.memory_space<vmem>>, %arg2: memref<128x256xbf16, #tpu.memory_space<vmem>>, %arg3: memref<256x128xf32, #tpu.memory_space<vmem>>, %arg4: memref<128x128xf32, #tpu.memory_space<vmem>>, %arg5: memref<1x1xf32, #tpu.memory_space<vmem>>, %arg6: memref<8x128xf32, #tpu.memory_space<vmem>>) attributes {dimension_semantics = [#tpu.dimension_semantics<parallel>], iteration_bounds = array<i64: 2>, scalar_prefetch = 0 : i64, scratch_operands = 0 : i64, tpu.core_type = #tpu.core_type<tc>, window_params = [{transform_indices = @transform_0, window_bounds = array<i64: 8, 128>}, {pipeline_mode = #tpu.pipeline_mode<synchronous>, transform_indices = @transform_1, window_bounds = array<i64: 128, 256>}, {pipeline_mode = #tpu.pipeline_mode<synchronous>, transform_indices = @transform_2, window_bounds = array<i64: 256, 128>}, {pipeline_mode = #tpu.pipeline_mode<synchronous>, transform_indices = @transform_3, window_bounds = array<i64: 128, 128>}, {pipeline_mode = #tpu.pipeline_mode<synchronous>, transform_indices = @transform_4, window_bounds = array<i64: 1, 1>}, {transform_indices = @transform_5, window_bounds = array<i64: 8, 128>}]} {
    %c0 = arith.constant 0 : index
    %c0_0 = arith.constant 0 : index
    %0 = vector.load %arg1[%c0, %c0_0] : memref<8x128xf32, #tpu.memory_space<vmem>>, vector<8x128xf32>
    %1 = arith.truncf %0 : vector<8x128xf32> to vector<8x128xbf16>
    %c0_1 = arith.constant 0 : index
    %c0_2 = arith.constant 0 : index
    %2 = vector.load %arg2[%c0_1, %c0_2] : memref<128x256xbf16, #tpu.memory_space<vmem>>, vector<128x256xbf16>
    %cst = arith.constant dense<0.000000e+00> : vector<8x256xf32>
    %3 = tpu.matmul %1, %2, %cst {dimension_numbers = #tpu.dot_dimension_numbers<[1], [0], [0], [1], [0, 0, 1, 1], [], []>} : vector<8x128xbf16>, vector<128x256xbf16>, vector<8x256xf32> -> vector<8x256xf32>
    %cst_3 = arith.constant 0.000000e+00 : f32
    %4 = vector.broadcast %cst_3 : f32 to vector<8x256xf32>
    %5 = arith.maximumf %3, %4 : vector<8x256xf32>
    %c0_4 = arith.constant 0 : index
    %c0_5 = arith.constant 0 : index
    %6 = vector.load %arg3[%c0_4, %c0_5] : memref<256x128xf32, #tpu.memory_space<vmem>>, vector<256x128xf32>
    %cst_6 = arith.constant dense<0.000000e+00> : vector<8x128xf32>
    %7 = tpu.matmul %5, %6, %cst_6 {dimension_numbers = #tpu.dot_dimension_numbers<[1], [0], [0], [1], [0, 0, 1, 1], [], []>} : vector<8x256xf32>, vector<256x128xf32>, vector<8x128xf32> -> vector<8x128xf32>
    %c0_7 = arith.constant 0 : index
    %c0_8 = arith.constant 0 : index
    %8 = vector.load %arg5[%c0_7, %c0_8] : memref<1x1xf32, #tpu.memory_space<vmem>>, vector<1x1xf32>
    %9 = vector.broadcast %8 : vector<1x1xf32> to vector<8x128xf32>
    %10 = arith.addf %7, %9 : vector<8x128xf32>
    %11 = math.tanh %10 : vector<8x128xf32>
    %12 = math.exp %11 : vector<8x128xf32>
    %13 = tpu.iota {dimensions = array<i32: 1>} : vector<8x128xi32>
    %c4_i32 = arith.constant 4 : i32
    %14 = vector.broadcast %c4_i32 : i32 to vector<8x128xi32>
    %15 = arith.cmpi slt, %13, %14 : vector<8x128xi32>
    %cst_9 = arith.constant 0.000000e+00 : f32
    %16 = vector.broadcast %cst_9 : f32 to vector<8x128xf32>
    %17 = arith.select %15, %12, %16 : vector<8x128xi1>, vector<8x128xf32>
    %cst_10 = arith.constant dense<0.000000e+00> : vector<8xf32>
    %18 = vector.multi_reduction <add>, %17, %cst_10 [1] : vector<8x128xf32> to vector<8xf32>
    %19 = vector.shape_cast %18 : vector<8xf32> to vector<8x1xf32>
    %cst_11 = arith.constant 9.99999974E-6 : f32
    %20 = vector.broadcast %cst_11 : f32 to vector<8x1xf32>
    %21 = arith.addf %19, %20 : vector<8x1xf32>
    %22 = tpu.reciprocal %21 {approx = true} : vector<8x1xf32> -> vector<8x1xf32>
    %23 = vector.broadcast %22 : vector<8x1xf32> to vector<8x128xf32>
    %24 = arith.mulf %17, %23 : vector<8x128xf32>
    %cst_12 = arith.constant 1.000000e+00 : f32
    %25 = vector.broadcast %cst_12 : f32 to vector<8x128xf32>
    %26 = arith.addf %24, %25 : vector<8x128xf32>
    %c0_13 = arith.constant 0 : index
    %c0_14 = arith.constant 0 : index
    %27 = vector.load %arg4[%c0_13, %c0_14] : memref<128x128xf32, #tpu.memory_space<vmem>>, vector<128x128xf32>
    %cst_15 = arith.constant dense<0.000000e+00> : vector<8x128xf32>
    %28 = tpu.matmul %26, %27, %cst_15 {dimension_numbers = #tpu.dot_dimension_numbers<[1], [0], [0], [1], [0, 0, 1, 1], [], []>} : vector<8x128xf32>, vector<128x128xf32>, vector<8x128xf32> -> vector<8x128xf32>
    %29 = arith.mulf %0, %28 : vector<8x128xf32>
    %c0_16 = arith.constant 0 : index
    %c0_17 = arith.constant 0 : index
    %30 = vector.load %arg6[%c0_16, %c0_17] : memref<8x128xf32, #tpu.memory_space<vmem>>, vector<8x128xf32>
    tpu.vector_store %arg6[%c0_16, %c0_17], %29 {strides = array<i32>} : memref<8x128xf32, #tpu.memory_space<vmem>>, vector<8x128xf32>,
    return
  }
  func.func @transform_0(%arg0: i32) -> (i32, i32) {
    %c0_i32 = arith.constant 0 : i32
    %c0_i32_0 = arith.constant 0 : i32
    return %arg0, %c0_i32 : i32, i32
  }
  func.func @transform_1(%arg0: i32) -> (i32, i32) {
    %c0_i32 = arith.constant 0 : i32
    %c0_i32_0 = arith.constant 0 : i32
    %c0_i32_1 = arith.constant 0 : i32
    return %c0_i32, %c0_i32_0 : i32, i32
  }
  func.func @transform_2(%arg0: i32) -> (i32, i32) {
    %c0_i32 = arith.constant 0 : i32
    %c0_i32_0 = arith.constant 0 : i32
    %c0_i32_1 = arith.constant 0 : i32
    return %c0_i32, %c0_i32_0 : i32, i32
  }
  func.func @transform_3(%arg0: i32) -> (i32, i32) {
    %c0_i32 = arith.constant 0 : i32
    %c0_i32_0 = arith.constant 0 : i32
    %c0_i32_1 = arith.constant 0 : i32
    return %c0_i32, %c0_i32_0 : i32, i32
  }
  func.func @transform_4(%arg0: i32) -> (i32, i32) {
    %c0_i32 = arith.constant 0 : i32
    %c0_i32_0 = arith.constant 0 : i32
    %c0_i32_1 = arith.constant 0 : i32
    return %c0_i32, %c0_i32_0 : i32, i32
  }
  func.func @transform_5(%arg0: i32) -> (i32, i32) {
    %c0_i32 = arith.constant 0 : i32
    %c0_i32_0 = arith.constant 0 : i32
    return %arg0, %c0_i32 : i32, i32
  }
}

</mosaic_0001>

<bundles_post_ra>
// kernel: attention_forward.1
= control target key start
LH: loop header
LB: loop body
LE: loop exit
PB: predicated region body
PF: predicated region fallthrough
CT: control target
= control target key end

     0   :  { %s965_s0 = inlined_call_operand.vmem [shape: f32[16,128], index: 0, kind: input, shape index: {}]   ;;  %s966_s1 = inlined_call_operand.hbm [shape: bf16[128,256], index: 1, kind: input, shape index: {}]   ;;  %s967_s2 = inlined_call_operand.hbm [shape: f32[256,128], index: 2, kind: input, shape index: {}]   ;;  %s968_s3 = inlined_call_operand.hbm [shape: f32[128,128], index: 3, kind: input, shape index: {}]   ;;  %s969_s4 = inlined_call_operand.<no memory space> [shape: f32[1,1], index: 4, kind: input, shape index: {}]   ;;  %s970_s5 = inlined_call_operand.vmem [shape: f32[16,128], index: 5, kind: output, shape index: {}]  }
   0x1   :  { %v10_v0 = vstv %s969_s4 }
   0x2   :  { %11 = vst [vmem:[#allocation2] sm:$0x1] %v10_v0 }
   0x3   :  { %12 = vsyncpa [#allocation4], 0 }
   0x4   :  { %13 = vsyncpa [#allocation6], 0  ;;  %s902_s20 = smov 0  }
   0x5 LB: > { %s908_s21 = sadd.s32 4294967295, %s861_s20   ;;  %p614_p0 = scmp.ge.s32.totalorder %s861_s20, 1  ;;  %s861_s20 = sphi %s902_s20, %s19_s20  }
   0x6   : > { %p160_p1 = scmp.lt.s32.totalorder %s861_s20, 3  ;;  %p729_p2 = scmp.eq.s32.totalorder %s908_s21, 0 }
   0x7   : > { %s185_s23 = sshll.u32 %s967_s2, 4  ;;  %s171_s27 = sshll.u32 %s966_s1, 4  ;;  %s186_s23 = int_to_ptr.hbm [resolvable:$true] %s185_s23  ;;  %s172_s27 = int_to_ptr.hbm [resolvable:$true] %s171_s27 }
   0x8   : > { %p916_p3 = pnand %p614_p0, %p160_p1  ;;  %s863_s28 = smov [#allocation5]  }
   0x9   : > { %s187_s29 = sshll.u32 %s863_s28, 4  ;;  %s864_s30 = smov [#allocation3]   ;;  %s188_s29 = int_to_ptr.vmem [resolvable:$true] %s187_s29 }
   0xa   : > { %p719_p4 = pneg %p916_p3  ;;  %s173_s6 = sshll.u32 %s864_s30, 4  ;;  %s174_s6 = int_to_ptr.vmem [resolvable:$true] %s173_s6 }
   0xb   : > { %s199_s9 = sshll.u32 %s968_s3, 4  ;;  %s865_s10 = smov 128   ;;  %s200_s9 = int_to_ptr.hbm [resolvable:$true] %s199_s9 }
   0xc   : > { %p720_p5 = pnand %p729_p2, %p719_p4  ;;  %s866_s11 = smov 8  }
   0xd   : > { %s867_s12 = smov [#allocation7]   ;;  %227 = sbr.rel (%p916_p3) target bundleno = 594 (0x252), region = 40 }
   0xe   : > { %725 = dma.hbm_to_vmem [thread:$0]  (!%p720_p5), %s186_s23, 4096, %s188_s29, [#allocation6], %s865_s10, %s865_s10, %s866_s11  }
   0xf   : > { %722 = dma.hbm_to_vmem [thread:$0]  (!%p720_p5), %s172_s27, 2048, %s174_s6, [#allocation4], %s865_s10, %s865_s10, %s866_s11  }
  0x10   : > { %s201_s13 = sshll.u32 %s867_s12, 4  ;;  %s202_s13 = int_to_ptr.vmem [resolvable:$true] %s201_s13 }
  0x11   : > { %728 = dma.hbm_to_vmem [thread:$0]  (!%p720_p5), %s200_s9, 2048, %s202_s13, [#allocation6], %s865_s10, %s865_s10, %s866_s11  }
  0x12   : > { %852 = dma.done.wait (%p729_p2), [#allocation4], 2048  }
  0x13   : > { %854 = vsyncadd (%p729_p2), [#allocation4], 4294965248 }
  0x14   : > { %856 = dma.done.wait (%p729_p2), [#allocation6], 6144  }
  0x15   : > { %858 = vsyncadd (%p729_p2), [#allocation6], 4294961152  ;;  %v683_v1 = vld [vmem:[#allocation3 + $0x70] sm:$0xf]  ;;  %v706_v2 = vld [vmem:[#allocation3 + $0x74] sm:$0xf0] }
  0x16   : > { %v705_v3 = vld [vmem:[#allocation3 + $0x74] sm:$0xf]  ;;  %v684_v4 = vor.u32 %v706_v2, %v683_v1  ;;  %v685_v5 = vld [vmem:[#allocation3 + $0x78] sm:$0xf0]  ;;  %v675_v6 = vld [vmem:[#allocation3 + $0x60] sm:$0xf] }
  0x17   : > { %v704_v7 = vld [vmem:[#allocation3 + $0x64] sm:$0xf0]  ;;  %v688_v8 = vor.u32 %v705_v3, %v685_v5  ;;  %v703_v9 = vld [vmem:[#allocation3 + $0x64] sm:$0xf]  ;;  %v677_v10 = vld [vmem:[#allocation3 + $0x68] sm:$0xf0] }
  0x18   : > { %370 = vmatpush.bf16.msra.mxu0 %v684_v4  ;;  %v676_v11 = vor.u32 %v704_v7, %v675_v6  ;;  %v680_v12 = vor.u32 %v703_v9, %v677_v10  ;;  %v667_v13 = vld [vmem:[#allocation3 + $0x50] sm:$0xf]  ;;  %v702_v14 = vld [vmem:[#allocation3 + $0x54] sm:$0xf0]  ;;  %v701_v15 = vld [vmem:[#allocation3 + $0x54] sm:$0xf] }
  0x19   : > { %383 = vmatpush.bf16.msra.mxu1 %v688_v8  ;;  %v669_v16 = vld [vmem:[#allocation3 + $0x58] sm:$0xf0]  ;;  %v668_v17 = vor.u32 %v702_v14, %v667_v13  ;;  %v659_v19 = vld [vmem:[#allocation3 + $0x40] sm:$0xf]  ;;  %v700_v20 = vld [vmem:[#allocation3 + $0x44] sm:$0xf0] }
  0x1a   : > { %v672_v18 = vor.u32 %v701_v15, %v669_v16  ;;  %v699_v21 = vld [vmem:[#allocation3 + $0x44] sm:$0xf]  ;;  %v661_v22 = vld [vmem:[#allocation3 + $0x48] sm:$0xf0]  ;;  %v660_v23 = vor.u32 %v700_v20, %v659_v19  ;;  %v413_v24 = vld [vmem:[#allocation5 + $0x78] sm:$0xff]  ;;  %p264_p6 = scmp.lt.s32.totalorder %s908_s21, 1 }
  0x1b   : > { %v412_v25 = vld [vmem:[#allocation5 + $0x70] sm:$0xff]  ;;  %v429_v26 = vld [vmem:[#allocation5 + $0xf8] sm:$0xff]  ;;  %v664_v27 = vor.u32 %v699_v21, %v661_v22  ;;  %437 = vmatpush.msra.mxu2 %v413_v24  ;;  %v411_v33 = vld [vmem:[#allocation5 + $0x68] sm:$0xff]  ;;  %v868_v20 = vmov 0  }
  0x1c   : > { %371 = vmatpush.bf16.msra.mxu0 %v676_v11  ;;  %v651_v28 = vld [vmem:[#allocation3 + $0x30] sm:$0xf]  ;;  %v698_v29 = vld [vmem:[#allocation3 + $0x34] sm:$0xf0]  ;;  %v697_v31 = vld [vmem:[#allocation3 + $0x34] sm:$0xf]  ;;  %457 = vmatpush.msra.mxu3 %v429_v26 }
  0x1d   : > { %384 = vmatpush.bf16.msra.mxu1 %v680_v12  ;;  %v428_v30 = vld [vmem:[#allocation5 + $0xf0] sm:$0xff]  ;;  %v653_v32 = vld [vmem:[#allocation3 + $0x38] sm:$0xf0]  ;;  %438 = vmatpush.msra.mxu2 %v412_v25  ;;  %v427_v34 = vld [vmem:[#allocation5 + $0xe8] sm:$0xff]  ;;  %v652_v35 = vor.u32 %v698_v29, %v651_v28  ;;  %s973_s21 = smov (!%p264_p6, %s908_s21), 1 }
  0x1e   : > { %458 = vmatpush.msra.mxu3 %v428_v30  ;;  %v410_v36 = vld [vmem:[#allocation5 + $0x60] sm:$0xff]  ;;  %v656_v37 = vor.u32 %v697_v31, %v653_v32  ;;  %v696_v39 = vld [vmem:[#allocation3 + $0x24] sm:$0xf0]  ;;  %v645_v42 = vld [vmem:[#allocation3 + $0x28] sm:$0xf0]  ;;  %s623_s14 = sshll.u32 %s973_s21, 3  ;;  %749 = vset.pattern.permute.xlu0 %v868_v20 }
  0x1f   : > { %v643_v38 = vld [vmem:[#allocation3 + $0x20] sm:$0xf]  ;;  %439 = vmatpush.msra.mxu2 %v411_v33  ;;  %v695_v41 = vld [vmem:[#allocation3 + $0x24] sm:$0xf]  ;;  %v409_v43 = vld [vmem:[#allocation5 + $0x58] sm:$0xff]  ;;  %s267_s17 = scalar_lea.vmem %s965_s0, %s623_s14  ;;  %s271_s4 = scalar_lea.vmem %s970_s5, %s623_s14 }
  0x20   : > { %372 = vmatpush.bf16.msra.mxu0 %v668_v17  ;;  %v426_v40 = vld [vmem:[#allocation5 + $0xe0] sm:$0xff]  ;;  %459 = vmatpush.msra.mxu3 %v427_v34  ;;  %v425_v44 = vld [vmem:[#allocation5 + $0xd8] sm:$0xff]  ;;  %v644_v45 = vor.u32 %v696_v39, %v643_v38  ;;  %v635_v46 = vld [vmem:[#allocation3 + $0x10] sm:$0xf]  ;;  %v648_v48 = vor.u32 %v695_v41, %v645_v42  ;;  %v480_v41 = vlaneseq }
  0x21   : > { %385 = vmatpush.bf16.msra.mxu1 %v672_v18  ;;  %440 = vmatpush.msra.mxu2 %v410_v36  ;;  %v408_v47 = vld [vmem:[#allocation5 + $0x50] sm:$0xff]  ;;  %v694_v49 = vld [vmem:[#allocation3 + $0x14] sm:$0xf0]  ;;  %v637_v52 = vld [vmem:[#allocation3 + $0x18] sm:$0xf0] }
  0x22   : > { %460 = vmatpush.msra.mxu3 %v426_v40  ;;  %v424_v50 = vld [vmem:[#allocation5 + $0xd0] sm:$0xff]  ;;  %v407_v53 = vld [vmem:[#allocation5 + $0x48] sm:$0xff]  ;;  %v636_v55 = vor.u32 %v694_v49, %v635_v46  ;;  %v406_v56 = vld [vmem:[#allocation5 + $0x40] sm:$0xff] }
  0x23   : > { %441 = vmatpush.msra.mxu2 %v409_v43  ;;  %v693_v51 = vld [vmem:[#allocation3 + $0x14] sm:$0xf]  ;;  %v423_v54 = vld [vmem:[#allocation5 + $0xc8] sm:$0xff]  ;;  %v627_v58 = vld [vmem:[#allocation3] sm:$0xf] }
  0x24   : > { %373 = vmatpush.bf16.msra.mxu0 %v660_v23  ;;  %461 = vmatpush.msra.mxu3 %v425_v44  ;;  %v640_v57 = vor.u32 %v693_v51, %v637_v52  ;;  %v692_v59 = vld [vmem:[#allocation3 + $0x4] sm:$0xf0]  ;;  %v422_v60 = vld [vmem:[#allocation5 + $0xc0] sm:$0xff]  ;;  %v629_v62 = vld [vmem:[#allocation3 + $0x8] sm:$0xf0]  ;;  %v481_v44 = vand.u32 127, %v480_v41 }
  0x25   : > { %386 = vmatpush.bf16.msra.mxu1 %v664_v27  ;;  %442 = vmatpush.msra.mxu2 %v408_v47  ;;  %v691_v61 = vld [vmem:[#allocation3 + $0x4] sm:$0xf]  ;;  %v405_v63 = vld [vmem:[#allocation5 + $0x38] sm:$0xff]  ;;  %v628_v1 = vor.u32 %v692_v59, %v627_v58  ;;  %v404_v3 = vld [vmem:[#allocation5 + $0x30] sm:$0xff] }
  0x26   : > { %462 = vmatpush.msra.mxu3 %v424_v50  ;;  %v421_v0 = vld [vmem:[#allocation5 + $0xb8] sm:$0xff]  ;;  %v632_v4 = vor.u32 %v691_v61, %v629_v62  ;;  %v420_v5 = vld [vmem:[#allocation5 + $0xb0] sm:$0xff]  ;;  %v403_v6 = vld [vmem:[#allocation5 + $0x28] sm:$0xff]  ;;  %vm482_vm0 = vcmp.lt.s32.totalorder %v481_v44, 4 }
  0x27   : > { %443 = vmatpush.msra.mxu2 %v407_v53  ;;  %v952_v2 = vld [vmem:[%s267_s17] sm:$0xff]  ;;  %v419_v8 = vld [vmem:[#allocation5 + $0xa8] sm:$0xff]  ;;  %v400_v13 = vld [vmem:[#allocation5 + $0x10] sm:$0xff] }
  0x28   : > { %374 = vmatpush.bf16.msra.mxu0 %v652_v35  ;;  %463 = vmatpush.msra.mxu3 %v423_v54  ;;  %v273_v7 = vpack.c.bf16 %v952_v2, %v952_v2  ;;  %v402_v9 = vld [vmem:[#allocation5 + $0x20] sm:$0xff]  ;;  %v401_v11 = vld [vmem:[#allocation5 + $0x18] sm:$0xff]  ;;  %v399_v14 = vld [vmem:[#allocation5 + $0x8] sm:$0xff] }
  0x29   : > { %387 = vmatpush.bf16.msra.mxu1 %v656_v37  ;;  %444 = vmatpush.msra.mxu2 %v406_v56  ;;  %v418_v10 = vld [vmem:[#allocation5 + $0xa0] sm:$0xff]  ;;  %v417_v12 = vld [vmem:[#allocation5 + $0x98] sm:$0xff]  ;;  %v416_v15 = vld [vmem:[#allocation5 + $0x90] sm:$0xff] }
  0x2a   : > { %464 = vmatpush.msra.mxu3 %v422_v60  ;;  %v398_v16 = vld [vmem:[#allocation5] sm:$0xff]  ;;  %v415_v17 = vld [vmem:[#allocation5 + $0x88] sm:$0xff]  ;;  %v750_v19 = vld [vmem:[#allocation2] ss:$0 sm:$0xff] }
  0x2b   : > { %445 = vmatpush.msra.mxu2 %v405_v63  ;;  %v414_v18 = vld [vmem:[#allocation5 + $0x80] sm:$0xff]  ;;  %434 = vperm.xlu0 %749, %v750_v19   ;;  %v505_v27 = vld [vmem:[#allocation7 + $0x78] sm:$0xff]  ;;  %v504_v28 = vld [vmem:[#allocation7 + $0x70] sm:$0xff] }
  0x2c   : > { %375 = vmatpush.bf16.msra.mxu0 %v644_v45  ;;  %465 = vmatpush.msra.mxu3 %v421_v0  ;;  %v503_v29 = vld [vmem:[#allocation7 + $0x68] sm:$0xff]  ;;  %v502_v30 = vld [vmem:[#allocation7 + $0x60] sm:$0xff]  ;;  %v501_v31 = vld [vmem:[#allocation7 + $0x58] sm:$0xff] }
  0x2d   : > { %388 = vmatpush.bf16.msra.mxu1 %v648_v48  ;;  %446 = vmatpush.msra.mxu2 %v404_v3  ;;  %v500_v33 = vld [vmem:[#allocation7 + $0x50] sm:$0xff]  ;;  %v499_v35 = vld [vmem:[#allocation7 + $0x48] sm:$0xff]  ;;  %v498_v38 = vld [vmem:[#allocation7 + $0x40] sm:$0xff] }
  0x2e   : > { %466 = vmatpush.msra.mxu3 %v420_v5  ;;  %v497_v40 = vld [vmem:[#allocation7 + $0x38] sm:$0xff]  ;;  %v496_v47 = vld [vmem:[#allocation7 + $0x30] sm:$0xff]  ;;  %v495_v48 = vld [vmem:[#allocation7 + $0x28] sm:$0xff] }
  0x2f   : > { %447 = vmatpush.msra.mxu2 %v403_v6  ;;  %v494_v49 = vld [vmem:[#allocation7 + $0x20] sm:$0xff]  ;;  %v493_v50 = vld [vmem:[#allocation7 + $0x18] sm:$0xff]  ;;  %v492_v51 = vld [vmem:[#allocation7 + $0x10] sm:$0xff] }
  0x30   : > { %376 = vmatpush.bf16.msra.mxu0 %v636_v55  ;;  %467 = vmatpush.msra.mxu3 %v419_v8  ;;  %v491_v52 = vld [vmem:[#allocation7 + $0x8] sm:$0xff]  ;;  %v490_v53 = vld [vmem:[#allocation7] sm:$0xff] }
  0x31   : > { %389 = vmatpush.bf16.msra.mxu1 %v640_v57  ;;  %448 = vmatpush.msra.mxu2 %v402_v9 }
  0x32   : > { %468 = vmatpush.msra.mxu3 %v418_v10 }
  0x33   : > { %449 = vmatpush.msra.mxu2 %v401_v11 }
  0x34   : > { %377 = vmatpush.bf16.msra.mxu0 %v628_v1  ;;  %469 = vmatpush.msra.mxu3 %v417_v12 }
  0x35   : > { %390 = vmatpush.bf16.msra.mxu1 %v632_v4  ;;  %450 = vmatpush.msra.mxu2 %v400_v13 }
  0x36   : > { %470 = vmatpush.msra.mxu3 %v416_v15 }
  0x37   : > { %378 = vmatmul.bf16.vlgmr.msra.gmra.mxu0 %v273_v7  ;;  %451 = vmatpush.msra.mxu2 %v399_v14 }
  0x38   : > { %391 = vmatmul.bf16.vlgmr.msra.gmra.mxu1 %v273_v7  ;;  %471 = vmatpush.msra.mxu3 %v415_v17 }
  0x39   : > { %452 = vmatpush.msra.mxu2 %v398_v16  ;;  %506 = vmatpush.msrb.mxu0 %v505_v27 }
  0x3a   : > { %472 = vmatpush.msra.mxu3 %v414_v18 }
  0x3b   : > { %507 = vmatpush.msrb.mxu0 %v504_v28 }
  0x3d   : > { %508 = vmatpush.msrb.mxu0 %v503_v29 }
  0x3f   : > { %509 = vmatpush.msrb.mxu0 %v502_v30 }
  0x41   : > { %510 = vmatpush.msrb.mxu0 %v501_v31 }
  0x43   : > { %511 = vmatpush.msrb.mxu0 %v500_v33 }
  0x45   : > { %512 = vmatpush.msrb.mxu0 %v499_v35 }
  0x47   : > { %513 = vmatpush.msrb.mxu0 %v498_v38 }
  0x49   : > { %514 = vmatpush.msrb.mxu0 %v497_v40 }
  0x4b   : > { %515 = vmatpush.msrb.mxu0 %v496_v47 }
  0x4d   : > { %516 = vmatpush.msrb.mxu0 %v495_v48 }
  0x4f   : > { %517 = vmatpush.msrb.mxu0 %v494_v49 }
  0x51   : > { %518 = vmatpush.msrb.mxu0 %v493_v50 }
  0x53   : > { %519 = vmatpush.msrb.mxu0 %v492_v51 }
  0x55   : > { %520 = vmatpush.msrb.mxu0 %v491_v52 }
  0x57   : > { %521 = vmatpush.msrb.mxu0 %v490_v53 }
  0x9d   : > { %v435_v32 = vpop.permute.xlu0 %434 }
  0xb4   : > { %v379_v21 = vpop.f32.mrf.mxu0 }
  0xb5   : > { %v396_v22 = vmax.f32 %v379_v21, 0.0  ;;  %v392_v23 = vpop.f32.mrf.mxu1 }
  0xb6   : > { %v397_v24 = vmax.f32 %v392_v23, 0.0 }
  0xb7   : > { %453 = vmatmul.f32.vlgmr.msra.gmra.mxu2 %v396_v22 }
  0xb8   : > { %473 = vmatmul.f32.vlgmr.msra.gmra.mxu3 %v397_v24 }
  0xbc   : > { %v381_v25 = vpop.f32.mrf.mxu0 }
  0xbd   : > { %v394_v26 = vpop.f32.mrf.mxu1 }
 0x13a   : > { %v454_v34 = vpop.f32.mrf.mxu2 }
 0x13b   : > { %v455_v36 = vadd.f32 %v454_v34, %v435_v32  ;;  %v474_v37 = vpop.f32.mrf.mxu3 }
 0x13d   : > { %v475_v39 = vadd.f32 %v474_v37, %v455_v36 }
 0x13f   : > { %751 = vtanh.f32 %v475_v39 }
 0x145   : > { %v752_v42 = vpop.eup %751 }
 0x146   : > { %v478_v43 = vmul.f32 1.442695, %v752_v42 }
 0x148   : > { %753 = vpow2.f32 %v478_v43 }
 0x14e   : > { %v754_v45 = vpop.eup %753 }
 0x14f   : > { %v483_v46 = vsel %vm482_vm0, %v754_v45, 0.0 }
 0x150   : > { %484 = vadd.xlane.f32.xlu0 %v483_v46 }
 0x1c3   : > { %v485_v54 = vpop.xlane.xlu0 %484 }
 0x1c4   : > { %v486_v55 = vadd.f32 1e-05, %v485_v54 }
 0x1c6   : > { %755 = vrcp.f32 %v486_v55 }
 0x1cc   : > { %v756_v56 = vpop.eup %755 }
 0x1cd   : > { %v488_v57 = vmul.f32 %v756_v56, %v483_v46 }
 0x1cf   : > { %v489_v58 = vadd.f32 1.0, %v488_v57 }
 0x1d1   : > { %522 = vmatmul.f32.vlgmr.msrb.gmra.mxu0 %v489_v58 }
 0x24e   : > { %v523_v59 = vpop.f32.mrf.mxu0 }
 0x24f   : > { %v526_v60 = vmul.f32 %v523_v59, %v952_v2 }
 0x251   : > { %527 = vst [vmem:[%s271_s4] sm:$0xff] %v526_v60 }
 0x252 PF: > { %s19_s20 = sadd.s32 1, %s861_s20  }
 0x253   : > { %p16_p7 = scmp.ge.s32.totalorder %s19_s20, 4  }
 0x255   :  { %18 = sbr.rel (!%p16_p7) target bundleno = 5 (0x5), region = 83 }
 0x25a   :  { %547 = vsyncpa [#allocation4], 1 }
 0x25b   :  { %549 = vsyncpa [#allocation4 + $0x1], 1 }
 0x25c   :  { %550 = vsyncpa [#allocation6], 1 }

</bundles_post_ra>
